<compile_context>
chip_gen: v6e
topology: v6e:2x2x1
jax: 0.10.0
libtpu: 0.0.40
codegen_flags: <defaults>
</compile_context>

<pallas_src>
import jax
import jax.numpy as jnp
from jax.experimental import pallas as pl
from jax.experimental.pallas import tpu as pltpu

HIDDEN = 128
LANES = 128
SUBLANES = 8


def dqn_kernel(x_ref, w1_ref, b1_ref, w2_ref, b2_ref, w3_ref, b3_ref, o_ref):
    # bf16 MXU inputs, f32 accumulation; biases/activations stay f32.
    h1 = jnp.dot(x_ref[...], w1_ref[...], preferred_element_type=jnp.float32) + b1_ref[...]
    h1 = jnp.maximum(h1, 0.0).astype(jnp.bfloat16)
    h2 = jnp.dot(h1, w2_ref[...], preferred_element_type=jnp.float32) + b2_ref[...]
    h2 = jnp.maximum(h2, 0.0).astype(jnp.bfloat16)
    out = jnp.dot(h2, w3_ref[...], preferred_element_type=jnp.float32) + b3_ref[...]
    o_ref[...] = out.astype(o_ref.dtype)  # lane-dense (tm, 128) unmasked bf16 store


def prepare_params(params):
    """One-time preprocessing: lane-pad the last layer and cast weights to bf16.

    Call once (e.g. after init / after each optimizer step), NOT per forward —
    keeps the per-call wrapper free of weight re-casting/padding traffic.
    """
    w1, b1, w2, b2, w3, b3 = params
    hidden = w1.shape[1]
    out_dim = w3.shape[1]

    out_pad = max(LANES, pl.cdiv(out_dim, LANES) * LANES)
    w3p = jnp.zeros((hidden, out_pad), w3.dtype).at[:, :out_dim].set(w3)
    b3p = jnp.zeros((1, out_pad), b3.dtype).at[:, :out_dim].set(b3)

    prepared = (
        w1.astype(jnp.bfloat16), b1.astype(jnp.float32),
        w2.astype(jnp.bfloat16), b2.astype(jnp.float32),
        w3p.astype(jnp.bfloat16), b3p.astype(jnp.float32),
    )
    return prepared, out_dim


def dqn_forward(x, prepared, *, tile_m=2048):
    """x: (B, input_dim) f32. prepared: output of prepare_params(params)."""
    (w1, b1, w2, b2, w3, b3), out_dim = prepared
    B, in_dim = x.shape
    hidden = w1.shape[1]
    out_pad = w3.shape[1]

    # bf16 input stream (halves x HBM->VMEM DMA bytes; accumulation stays f32).
    xb = x.astype(jnp.bfloat16)

    # Batch tile: sublane-aligned, capped at tile_m, and capped at ~B/2 so the
    # 'parallel' grid axis has >= 2 steps whenever B >= 16 (v7x 2-TC sharding).
    b_aligned = max(SUBLANES, pl.cdiv(B, SUBLANES) * SUBLANES)
    half = pl.cdiv(pl.cdiv(b_aligned, 2), SUBLANES) * SUBLANES
    tm = min(tile_m, max(SUBLANES, half))
    grid = (pl.cdiv(B, tm),)  # ragged last block handled by Pallas (no x pad copy)

    flops = 2 * B * (in_dim * hidden + hidden * hidden + hidden * out_pad)
    bytes_accessed = (
        B * in_dim * 2                                     # bf16 x
        + (w1.size + w2.size + w3.size) * 2                # bf16 weights
        + (b1.size + b2.size + b3.size) * 4                # f32 biases
        + B * out_pad * 2                                  # bf16 padded output
    )

    out = pl.pallas_call(
        dqn_kernel,
        out_shape=jax.ShapeDtypeStruct((B, out_pad), jnp.bfloat16),
        grid=grid,
        in_specs=[
            pl.BlockSpec((tm, in_dim), lambda i: (i, 0)),       # x tile (pipelined)
            pl.BlockSpec((in_dim, hidden), lambda i: (0, 0)),   # w1 resident
            pl.BlockSpec((1, hidden), lambda i: (0, 0)),        # b1 resident
            pl.BlockSpec((hidden, hidden), lambda i: (0, 0)),   # w2 resident
            pl.BlockSpec((1, hidden), lambda i: (0, 0)),        # b2 resident
            pl.BlockSpec((hidden, out_pad), lambda i: (0, 0)),  # w3 (lane-padded)
            pl.BlockSpec((1, out_pad), lambda i: (0, 0)),       # b3 (lane-padded)
        ],
        out_specs=pl.BlockSpec((tm, out_pad), lambda i: (i, 0)),
        compiler_params=pltpu.CompilerParams(
            dimension_semantics=("parallel",)),
        cost_estimate=pl.CostEstimate(
            flops=flops, transcendentals=0, bytes_accessed=bytes_accessed),
    )(xb, w1, b1, w2, b2, w3, b3)

    # Slice back to the logical (B, out_dim) result, f32 interface.
    return out[:, :out_dim].astype(jnp.float32)


def init_params(key, input_dim, output_dim, hidden=HIDDEN):
    # Deterministic init mimicking PyTorch nn.Linear (uniform +/- 1/sqrt(fan_in)).
    ks = jax.random.split(key, 6)

    def lin(kw, kb, fan_in, fan_out):
        bound = 1.0 / jnp.sqrt(fan_in)
        # Stored as (in, out) — the transpose of PyTorch's (out, in) weight.
        w = jax.random.uniform(kw, (fan_in, fan_out), jnp.float32, -bound, bound)
        b = jax.random.uniform(kb, (1, fan_out), jnp.float32, -bound, bound)
        return w, b

    w1, b1 = lin(ks[0], ks[1], input_dim, hidden)
    w2, b2 = lin(ks[2], ks[3], hidden, hidden)
    w3, b3 = lin(ks[4], ks[5], hidden, output_dim)
    return (w1, b1, w2, b2, w3, b3)


def dqn_reference(x, params):
    # Pure-f32 reference (PyTorch semantics).
    w1, b1, w2, b2, w3, b3 = params
    h1 = jnp.maximum(x @ w1 + b1, 0.0)
    h2 = jnp.maximum(h1 @ w2 + b2, 0.0)
    return h2 @ w3 + b3


if __name__ == "__main__":
    key = jax.random.PRNGKey(0)
    kx, kp = jax.random.split(key)

    batch, input_dim, output_dim = 8, 32, 8
    x = jax.random.normal(kx, (batch, input_dim), dtype=jnp.float32)
    params = init_params(kp, input_dim, output_dim)

    prepared = prepare_params(params)   # hoisted one-time weight prep

    out = dqn_forward(x, prepared)
    out = jax.block_until_ready(out)

    ref = dqn_reference(x, params)
    assert out.shape == (batch, output_dim)
    # bf16 inputs/weights/output-store with f32 accumulation: loosened tolerance
    # vs the pure-f32 reference.
    assert jnp.allclose(out, ref, atol=4e-2, rtol=4e-2), (
        f"max abs err {jnp.max(jnp.abs(out - ref))}")

    print("KERNEL_OK")
</pallas_src>

<mosaic_0001>
module attributes {stable_mosaic.version = 11 : i64} {
  func.func @dqn_kernel(%arg0: i32, %arg1: memref<8x32xbf16, #tpu.memory_space<vmem>>, %arg2: memref<32x128xbf16, #tpu.memory_space<vmem>>, %arg3: memref<1x128xf32, #tpu.memory_space<vmem>>, %arg4: memref<128x128xbf16, #tpu.memory_space<vmem>>, %arg5: memref<1x128xf32, #tpu.memory_space<vmem>>, %arg6: memref<128x128xbf16, #tpu.memory_space<vmem>>, %arg7: memref<1x128xf32, #tpu.memory_space<vmem>>, %arg8: memref<8x128xbf16, #tpu.memory_space<vmem>>) attributes {dimension_semantics = [#tpu.dimension_semantics<parallel>], iteration_bounds = array<i64: 1>, scalar_prefetch = 0 : i64, scratch_operands = 0 : i64, tpu.core_type = #tpu.core_type<tc>, window_params = [{transform_indices = @transform_0, window_bounds = array<i64: 8, 32>}, {pipeline_mode = #tpu.pipeline_mode<synchronous>, transform_indices = @transform_1, window_bounds = array<i64: 32, 128>}, {pipeline_mode = #tpu.pipeline_mode<synchronous>, transform_indices = @transform_2, window_bounds = array<i64: 1, 128>}, {pipeline_mode = #tpu.pipeline_mode<synchronous>, transform_indices = @transform_3, window_bounds = array<i64: 128, 128>}, {pipeline_mode = #tpu.pipeline_mode<synchronous>, transform_indices = @transform_4, window_bounds = array<i64: 1, 128>}, {pipeline_mode = #tpu.pipeline_mode<synchronous>, transform_indices = @transform_5, window_bounds = array<i64: 128, 128>}, {pipeline_mode = #tpu.pipeline_mode<synchronous>, transform_indices = @transform_6, window_bounds = array<i64: 1, 128>}, {transform_indices = @transform_7, window_bounds = array<i64: 8, 128>}]} {
    %c0 = arith.constant 0 : index
    %c0_0 = arith.constant 0 : index
    %0 = vector.load %arg1[%c0, %c0_0] : memref<8x32xbf16, #tpu.memory_space<vmem>>, vector<8x32xbf16>
    %c0_1 = arith.constant 0 : index
    %c0_2 = arith.constant 0 : index
    %1 = vector.load %arg2[%c0_1, %c0_2] : memref<32x128xbf16, #tpu.memory_space<vmem>>, vector<32x128xbf16>
    %cst = arith.constant dense<0.000000e+00> : vector<8x128xf32>
    %2 = tpu.matmul %0, %1, %cst {dimension_numbers = #tpu.dot_dimension_numbers<[1], [0], [0], [1], [0, 0, 1, 1], [], []>} : vector<8x32xbf16>, vector<32x128xbf16>, vector<8x128xf32> -> vector<8x128xf32>
    %c0_3 = arith.constant 0 : index
    %c0_4 = arith.constant 0 : index
    %3 = vector.load %arg3[%c0_3, %c0_4] : memref<1x128xf32, #tpu.memory_space<vmem>>, vector<1x128xf32>
    %4 = vector.broadcast %3 : vector<1x128xf32> to vector<8x128xf32>
    %5 = arith.addf %2, %4 : vector<8x128xf32>
    %cst_5 = arith.constant 0.000000e+00 : f32
    %6 = vector.broadcast %cst_5 : f32 to vector<8x128xf32>
    %7 = arith.maximumf %5, %6 : vector<8x128xf32>
    %8 = arith.truncf %7 : vector<8x128xf32> to vector<8x128xbf16>
    %c0_6 = arith.constant 0 : index
    %c0_7 = arith.constant 0 : index
    %9 = vector.load %arg4[%c0_6, %c0_7] : memref<128x128xbf16, #tpu.memory_space<vmem>>, vector<128x128xbf16>
    %cst_8 = arith.constant dense<0.000000e+00> : vector<8x128xf32>
    %10 = tpu.matmul %8, %9, %cst_8 {dimension_numbers = #tpu.dot_dimension_numbers<[1], [0], [0], [1], [0, 0, 1, 1], [], []>} : vector<8x128xbf16>, vector<128x128xbf16>, vector<8x128xf32> -> vector<8x128xf32>
    %c0_9 = arith.constant 0 : index
    %c0_10 = arith.constant 0 : index
    %11 = vector.load %arg5[%c0_9, %c0_10] : memref<1x128xf32, #tpu.memory_space<vmem>>, vector<1x128xf32>
    %12 = vector.broadcast %11 : vector<1x128xf32> to vector<8x128xf32>
    %13 = arith.addf %10, %12 : vector<8x128xf32>
    %cst_11 = arith.constant 0.000000e+00 : f32
    %14 = vector.broadcast %cst_11 : f32 to vector<8x128xf32>
    %15 = arith.maximumf %13, %14 : vector<8x128xf32>
    %16 = arith.truncf %15 : vector<8x128xf32> to vector<8x128xbf16>
    %c0_12 = arith.constant 0 : index
    %c0_13 = arith.constant 0 : index
    %17 = vector.load %arg6[%c0_12, %c0_13] : memref<128x128xbf16, #tpu.memory_space<vmem>>, vector<128x128xbf16>
    %cst_14 = arith.constant dense<0.000000e+00> : vector<8x128xf32>
    %18 = tpu.matmul %16, %17, %cst_14 {dimension_numbers = #tpu.dot_dimension_numbers<[1], [0], [0], [1], [0, 0, 1, 1], [], []>} : vector<8x128xbf16>, vector<128x128xbf16>, vector<8x128xf32> -> vector<8x128xf32>
    %c0_15 = arith.constant 0 : index
    %c0_16 = arith.constant 0 : index
    %19 = vector.load %arg7[%c0_15, %c0_16] : memref<1x128xf32, #tpu.memory_space<vmem>>, vector<1x128xf32>
    %20 = vector.broadcast %19 : vector<1x128xf32> to vector<8x128xf32>
    %21 = arith.addf %18, %20 : vector<8x128xf32>
    %22 = arith.truncf %21 : vector<8x128xf32> to vector<8x128xbf16>
    %c0_17 = arith.constant 0 : index
    %c0_18 = arith.constant 0 : index
    %23 = vector.load %arg8[%c0_17, %c0_18] : memref<8x128xbf16, #tpu.memory_space<vmem>>, vector<8x128xbf16>
    tpu.vector_store %arg8[%c0_17, %c0_18], %22 {strides = array<i32>} : memref<8x128xbf16, #tpu.memory_space<vmem>>, vector<8x128xbf16>,
    return
  }
  func.func @transform_0(%arg0: i32) -> (i32, i32) {
    %c0_i32 = arith.constant 0 : i32
    %c0_i32_0 = arith.constant 0 : i32
    return %arg0, %c0_i32 : i32, i32
  }
  func.func @transform_1(%arg0: i32) -> (i32, i32) {
    %c0_i32 = arith.constant 0 : i32
    %c0_i32_0 = arith.constant 0 : i32
    %c0_i32_1 = arith.constant 0 : i32
    return %c0_i32, %c0_i32_0 : i32, i32
  }
  func.func @transform_2(%arg0: i32) -> (i32, i32) {
    %c0_i32 = arith.constant 0 : i32
    %c0_i32_0 = arith.constant 0 : i32
    %c0_i32_1 = arith.constant 0 : i32
    return %c0_i32, %c0_i32_0 : i32, i32
  }
  func.func @transform_3(%arg0: i32) -> (i32, i32) {
    %c0_i32 = arith.constant 0 : i32
    %c0_i32_0 = arith.constant 0 : i32
    %c0_i32_1 = arith.constant 0 : i32
    return %c0_i32, %c0_i32_0 : i32, i32
  }
  func.func @transform_4(%arg0: i32) -> (i32, i32) {
    %c0_i32 = arith.constant 0 : i32
    %c0_i32_0 = arith.constant 0 : i32
    %c0_i32_1 = arith.constant 0 : i32
    return %c0_i32, %c0_i32_0 : i32, i32
  }
  func.func @transform_5(%arg0: i32) -> (i32, i32) {
    %c0_i32 = arith.constant 0 : i32
    %c0_i32_0 = arith.constant 0 : i32
    %c0_i32_1 = arith.constant 0 : i32
    return %c0_i32, %c0_i32_0 : i32, i32
  }
  func.func @transform_6(%arg0: i32) -> (i32, i32) {
    %c0_i32 = arith.constant 0 : i32
    %c0_i32_0 = arith.constant 0 : i32
    %c0_i32_1 = arith.constant 0 : i32
    return %c0_i32, %c0_i32_0 : i32, i32
  }
  func.func @transform_7(%arg0: i32) -> (i32, i32) {
    %c0_i32 = arith.constant 0 : i32
    %c0_i32_0 = arith.constant 0 : i32
    return %arg0, %c0_i32 : i32, i32
  }
}

</mosaic_0001>

<bundles_post_ra>
// kernel: tpu_custom_call.1
= control target key start
LH: loop header
LB: loop body
LE: loop exit
PB: predicated region body
PF: predicated region fallthrough
CT: control target
= control target key end

     0   :  { %12 = vsyncpa [#allocation3], 0  ;;  %s726_s0 = inlined_call_operand.hbm [shape: bf16[8,32], index: 0, kind: input, shape index: {}]   ;;  %s727_s1 = inlined_call_operand.hbm [shape: bf16[32,128], index: 1, kind: input, shape index: {}]   ;;  %s728_s2 = inlined_call_operand.vmem [shape: f32[1,128], index: 2, kind: input, shape index: {}]   ;;  %s729_s3 = inlined_call_operand.hbm [shape: bf16[128,128], index: 3, kind: input, shape index: {}]   ;;  %s730_s4 = inlined_call_operand.vmem [shape: f32[1,128], index: 4, kind: input, shape index: {}]   ;;  %s731_s5 = inlined_call_operand.hbm [shape: bf16[128,128], index: 5, kind: input, shape index: {}]   ;;  %s732_s6 = inlined_call_operand.vmem [shape: f32[1,128], index: 6, kind: input, shape index: {}]   ;;  %s733_s7 = inlined_call_operand.hbm [shape: bf16[8,128], index: 7, kind: output, shape index: {}]  }
   0x1   :  { %13 = vsyncpa [#allocation6], 0 }
   0x2   :  { %14 = vsyncpa [#allocation9], 0 }
   0x3   :  { %15 = vsyncpa [#allocation4], 0  ;;  %s620_s24 = smov [#allocation5]  }
   0x4   :  { %s31_s25 = sshll.u32 %s620_s24, 4  ;;  %s32_s25 = int_to_ptr.vmem [resolvable:$true] %s31_s25 }
   0x5   :  { %s520_s26 = scalar_lea.vmem %s32_s25, 256  ;;  %p525_p1 = scmp.lt.s32.totalorder %s32_s25, %s32_s25 }
   0x6   :  { %p521_p0 = scmp.ne.s32.totalorder %s32_s25, %s520_s26  ;;  %p526_p2 = scmp.lt.s32.totalorder %s520_s26, %s520_s26 }
   0x8   :  { %p527_p3 = por %p526_p2, %p525_p1 }
   0xa   :  { %p528_p4 = pnand %p527_p3, %p521_p0 }
   0xc   :  { %531 = shalt.err (!%p528_p4)
}
   0xd   :  { %s621_s27 = smov 64   ;;  %s622_s28 = smov 4  }
   0xe   :  { %37 = dma.hbm_to_vmem [thread:$0]  %s727_s1, 256, %s32_s25, [#allocation6], %s621_s27, %s621_s27, %s622_s28  }
   0xf   :  { %s623_s8 = smov [#allocation2]   ;;  %s624_s10 = smov [#allocation7]  }
  0x10   :  { %s22_s9 = sshll.u32 %s623_s8, 4  ;;  %s45_s11 = sshll.u32 %s624_s10, 4  ;;  %s23_s9 = int_to_ptr.vmem [resolvable:$true] %s22_s9  ;;  %s46_s11 = int_to_ptr.vmem [resolvable:$true] %s45_s11 }
  0x11   :  { %s540_s12 = scalar_lea.vmem %s23_s9, 64  ;;  %p545_p6 = scmp.lt.s32.totalorder %s23_s9, %s23_s9 }
  0x12   :  { %p541_p5 = scmp.ne.s32.totalorder %s23_s9, %s540_s12  ;;  %p546_p7 = scmp.lt.s32.totalorder %s540_s12, %s540_s12 }
  0x14   :  { %p547_p8 = por %p546_p7, %p545_p6 }
  0x16   :  { %p548_p9 = pnand %p547_p8, %p541_p5 }
  0x18   :  { %551 = shalt.err (!%p548_p9)
}
  0x19   :  { %25 = dma.hbm_to_vmem [thread:$0]  %s726_s0, 64, %s23_s9, [#allocation3]  }
  0x1a   :  { %s560_s15 = scalar_lea.vmem %s46_s11, 1024  ;;  %p565_p11 = scmp.lt.s32.totalorder %s46_s11, %s46_s11 }
  0x1b   :  { %p561_p10 = scmp.ne.s32.totalorder %s46_s11, %s560_s15  ;;  %p566_p12 = scmp.lt.s32.totalorder %s560_s15, %s560_s15 }
  0x1d   :  { %p567_p13 = por %p566_p12, %p565_p11 }
  0x1f   :  { %p568_p0 = pnand %p567_p13, %p561_p10 }
  0x21   :  { %571 = shalt.err (!%p568_p0)
}
  0x22   :  { %51 = dma.hbm_to_vmem [thread:$0]  %s729_s3, 1024, %s46_s11, [#allocation6], %s621_s27, %s621_s27, %s622_s28  }
  0x23   :  { %s625_s17 = smov [#allocation8]  }
  0x24   :  { %s59_s18 = sshll.u32 %s625_s17, 4  ;;  %s60_s18 = int_to_ptr.vmem [resolvable:$true] %s59_s18 }
  0x25   :  { %s580_s19 = scalar_lea.vmem %s60_s18, 1024  ;;  %p585_p2 = scmp.lt.s32.totalorder %s60_s18, %s60_s18 }
  0x26   :  { %p581_p1 = scmp.ne.s32.totalorder %s60_s18, %s580_s19  ;;  %p586_p3 = scmp.lt.s32.totalorder %s580_s19, %s580_s19 }
  0x28   :  { %p587_p4 = por %p586_p3, %p585_p2 }
  0x2a   :  { %p588_p5 = pnand %p587_p4, %p581_p1 }
  0x2c   :  { %591 = shalt.err (!%p588_p5)
}
  0x2d   :  { %65 = dma.hbm_to_vmem [thread:$0]  %s731_s5, 1024, %s60_s18, [#allocation9], %s621_s27, %s621_s27, %s622_s28  }
  0x2e   :  { %612 = dma.done.wait [#allocation3], 64  }
  0x2f   :  { %613 = vsyncadd [#allocation3], 4294967232 }
  0x30   :  { %614 = dma.done.wait [#allocation6], 1280  }
  0x31   :  { %615 = vsyncadd [#allocation6], 4294966016 }
  0x32   :  { %616 = dma.done.wait [#allocation9], 1024  }
  0x33   :  { %617 = vsyncadd [#allocation9], 4294966272  ;;  %v626_v0 = vmov 0.0   ;;  %vm627_vm0 = vmmov 0   ;;  %v494_v1 = vld [vmem:[#allocation5 + $0x8] sm:$0xff]   ;;  %v495_v2 = vld [vmem:[#allocation5] sm:$0xff]  }
  0x34   :  { %437 = vmatprep.subr.bf16.mxu0 %v626_v0  ;;  %441 = vmatprep.mubr.msk.bf16.mxu0 %vm627_vm0, %v626_v0  ;;  %v496_v3 = vld [vmem:[#allocation7 + $0x38] sm:$0xff]   ;;  %vm105_vm1 = vcmask 261120   ;;  %v497_v4 = vld [vmem:[#allocation7 + $0x30] sm:$0xff]   ;;  %v81_v5 = vld [vmem:[#allocation2] sm:$0xf]  ;;  %s628_s24 = smov [#allocation10]  }
  0x35   :  { %445 = vmatprep.subr.bf16.mxu1 %v626_v0  ;;  %461 = vmatprep.mubr.msk.bf16.mxu1 %vm627_vm0, %v626_v0  ;;  %v498_v6 = vld [vmem:[#allocation7 + $0x28] sm:$0xff]   ;;  %v499_v7 = vld [vmem:[#allocation7 + $0x20] sm:$0xff]   ;;  %v500_v8 = vld [vmem:[#allocation7 + $0x18] sm:$0xff]   ;;  %s383_s25 = sshll.u32 %s628_s24, 4  ;;  %s384_s25 = int_to_ptr.vmem [resolvable:$true] %s383_s25 }
  0x36   :  { %438 = vmatpush3.bf16.msra.mxu0 %v494_v1  ;;  %446 = vmatpush3.bf16.msra.mxu1 %v496_v3  ;;  %v501_v9 = vld [vmem:[#allocation7 + $0x10] sm:$0xff]   ;;  %v502_v10 = vld [vmem:[#allocation7 + $0x8] sm:$0xff]   ;;  %v503_v11 = vld [vmem:[#allocation7] sm:$0xff]   ;;  %p597_p7 = scmp.lt.s32.totalorder %s384_s25, %s384_s25 }
  0x37   :  { %439 = vmatprep.subr.bf16.mxu0 %v626_v0  ;;  %447 = vmatprep.subr.bf16.mxu1 %v626_v0  ;;  %v504_v12 = vld [vmem:[#allocation8 + $0x38] sm:$0xff]   ;;  %v505_v13 = vld [vmem:[#allocation8 + $0x30] sm:$0xff]   ;;  %v506_v14 = vld [vmem:[#allocation8 + $0x28] sm:$0xff]  }
  0x38   :  { %v507_v15 = vld [vmem:[#allocation8 + $0x20] sm:$0xff]   ;;  %v508_v16 = vld [vmem:[#allocation8 + $0x18] sm:$0xff]   ;;  %v509_v17 = vld [vmem:[#allocation8 + $0x10] sm:$0xff]  }
  0x39   :  { %v394_v18 = vld [vmem:[%s728_s2] ss:$0 sm:$0xff]  ;;  %v511_v27 = vld [vmem:[#allocation8] sm:$0xff]  }
  0x3a   :  { %440 = vmatpush3.bf16.msra.mxu0 %v495_v2  ;;  %448 = vmatpush3.bf16.msra.mxu1 %v497_v4  ;;  %v510_v26 = vld [vmem:[#allocation8 + $0x8] sm:$0xff]  }
  0x3b   :  { %465 = vmatprep.subr.bf16.mxu0 %v626_v0  ;;  %449 = vmatprep.subr.bf16.mxu1 %v626_v0  ;;  %v398_v28 = vld [vmem:[%s730_s4] ss:$0 sm:$0xff]  ;;  %s592_s4 = scalar_lea.vmem %s384_s25, 64 }
  0x3c   :  { %v407_v36 = vld [vmem:[%s732_s6] ss:$0 sm:$0xff]  ;;  %p593_p6 = scmp.ne.s32.totalorder %s384_s25, %s592_s4  ;;  %p598_p8 = scmp.lt.s32.totalorder %s592_s4, %s592_s4 }
  0x3d   :  { %442 = vmatmul.mubr.msk.bf16.vlgmr.msra.gmra.mxu0 %vm105_vm1, %v81_v5 }
  0x3e   :  { %481 = vmatprep.mubr.msk.bf16.mxu0 %vm627_vm0, %v626_v0  ;;  %450 = vmatpush3.bf16.msra.mxu1 %v498_v6  ;;  %p599_p9 = por %p598_p8, %p597_p7 }
  0x3f   :  { %451 = vmatprep.subr.bf16.mxu1 %v626_v0  ;;  %466 = vmatpush3.bf16.msra.mxu0 %v504_v12 }
  0x40   :  { %467 = vmatprep.subr.bf16.mxu0 %v626_v0  ;;  %p600_p10 = pnand %p599_p9, %p593_p6 }
  0x42   :  { %452 = vmatpush3.bf16.msra.mxu1 %v499_v7 }
  0x43   :  { %453 = vmatprep.subr.bf16.mxu1 %v626_v0  ;;  %468 = vmatpush3.bf16.msra.mxu0 %v505_v13 }
  0x44   :  { %469 = vmatprep.subr.bf16.mxu0 %v626_v0 }
  0x46   :  { %454 = vmatpush3.bf16.msra.mxu1 %v500_v8 }
  0x47   :  { %455 = vmatprep.subr.bf16.mxu1 %v626_v0  ;;  %470 = vmatpush3.bf16.msra.mxu0 %v506_v14 }
  0x48   :  { %471 = vmatprep.subr.bf16.mxu0 %v626_v0 }
  0x4a   :  { %456 = vmatpush3.bf16.msra.mxu1 %v501_v9 }
  0x4b   :  { %457 = vmatprep.subr.bf16.mxu1 %v626_v0  ;;  %472 = vmatpush3.bf16.msra.mxu0 %v507_v15 }
  0x4c   :  { %473 = vmatprep.subr.bf16.mxu0 %v626_v0 }
  0x4e   :  { %458 = vmatpush3.bf16.msra.mxu1 %v502_v10 }
  0x4f   :  { %459 = vmatprep.subr.bf16.mxu1 %v626_v0  ;;  %474 = vmatpush3.bf16.msra.mxu0 %v508_v16 }
  0x50   :  { %475 = vmatprep.subr.bf16.mxu0 %v626_v0 }
  0x52   :  { %460 = vmatpush3.bf16.msra.mxu1 %v503_v11 }
  0x53   :  { %476 = vmatpush3.bf16.msra.mxu0 %v509_v17 }
  0x54   :  { %477 = vmatprep.subr.bf16.mxu0 %v626_v0 }
  0x57   :  { %478 = vmatpush3.bf16.msra.mxu0 %v510_v26 }
  0x58   :  { %479 = vmatprep.subr.bf16.mxu0 %v626_v0 }
  0x5b   :  { %480 = vmatpush3.bf16.msra.mxu0 %v511_v27 }
  0xfd   :  { %v143_v19 = vpop.f32.mrf.mxu0 }
  0xfe   :  { %v144_v20 = vadd.f32 %v394_v18, %v143_v19 }
  0xff   :  { %v443_v21 = vpop.f32.mrf.mxu0 }
 0x100   :  { %v149_v22 = vmax.f32 %v144_v20, 0.0 }
 0x101   :  { %v146_v23 = vpop.f32.mrf.mxu0 }
 0x102   :  { %v150_v24 = vpack.c.bf16 %v149_v22, %v149_v22 }
 0x103   :  { %v444_v25 = vpop.f32.mrf.mxu0 }
 0x104   :  { %462 = vmatmul.mubr.bf16.vlgmr.msra.gmra.mxu1 %v150_v24 }
 0x1c4   :  { %v256_v29 = vpop.f32.mrf.mxu1 }
 0x1c5   :  { %v257_v30 = vadd.f32 %v398_v28, %v256_v29 }
 0x1c6   :  { %v463_v31 = vpop.f32.mrf.mxu1 }
 0x1c7   :  { %v262_v32 = vmax.f32 %v257_v30, 0.0 }
 0x1c8   :  { %v259_v33 = vpop.f32.mrf.mxu1 }
 0x1c9   :  { %v263_v34 = vpack.c.bf16 %v262_v32, %v262_v32 }
 0x1ca   :  { %v464_v35 = vpop.f32.mrf.mxu1 }
 0x1cb   :  { %482 = vmatmul.mubr.bf16.vlgmr.msra.gmra.mxu0 %v263_v34 }
 0x28b   :  { %v369_v37 = vpop.f32.mrf.mxu0 }
 0x28c   :  { %v370_v38 = vadd.f32 %v407_v36, %v369_v37 }
 0x28d   :  { %v483_v39 = vpop.f32.mrf.mxu0 }
 0x28e   :  { %v375_v40 = vpack.c.bf16 %v370_v38, %v370_v38 }
 0x28f   :  { %v372_v41 = vpop.f32.mrf.mxu0 }
 0x290   :  { %376 = vst [vmem:[#allocation10] sm:$0xf] %v375_v40 }
 0x291   :  { %v484_v42 = vpop.f32.mrf.mxu0 }
 0x292   :  { %603 = shalt.err (!%p600_p10)
}
 0x293   :  { %386 = dma.vmem_to_hbm [thread:$0]  %s384_s25, 64, %s733_s7, [#allocation4]  }
 0x294   :  { %618 = dma.done.wait [#allocation4], 64  }
 0x295   :  { %619 = vsyncadd [#allocation4], 4294967232 }
 0x296   :  { %390 = vsyncpa [#allocation3], 1 }
 0x297   :  { %391 = vsyncpa [#allocation6], 1 }
 0x298   :  { %392 = vsyncpa [#allocation9], 1 }
 0x299   :  { %393 = vsyncpa [#allocation4], 1 }

</bundles_post_ra>
